<compile_context>
chip_gen: v5e
topology: v5e:2x2
jax: 0.10.0
libtpu: 0.0.40
codegen_flags: <defaults>
</compile_context>

<pallas_src>
import functools

import jax
import jax.numpy as jnp
from jax import lax
from jax.experimental import pallas as pl
from jax.experimental.pallas import tpu as pltpu


# ---------------------------------------------------------------------------
# Kernel 1: one-shot causal (tril) masking of the learned sparse matrix.
# Runs once, outside the per-batch grid loop.
# ---------------------------------------------------------------------------
def _causal_mask_kernel(sparse_ref, out_ref):
    L = out_ref.shape[0]
    row = lax.broadcasted_iota(jnp.int32, (L, L), 0)
    col = lax.broadcasted_iota(jnp.int32, (L, L), 1)
    sp = sparse_ref[...]
    out_ref[...] = jnp.where(col <= row, sp, jnp.zeros_like(sp)).astype(out_ref.dtype)


def _causal_mask_sparse(sparse_mat):
    L = sparse_mat.shape[0]
    return pl.pallas_call(
        _causal_mask_kernel,
        out_shape=jax.ShapeDtypeStruct((L, L), sparse_mat.dtype),
    )(sparse_mat)


# ---------------------------------------------------------------------------
# Kernel 2: fused projection + bias + padding-mask + sparse mixing.
# Processes Bt batch elements per grid step.
# ---------------------------------------------------------------------------
def _togepi_sparse_kernel(x_ref, wt_ref, b_ref, pmask_ref, sparse_ref, out_ref,
                          *, matmul_dtype):
    # x_ref      : (Bt, L, D_in)
    # wt_ref     : (D_in, D_out)   pre-transposed Linear weight
    # b_ref      : (1, D_out)
    # pmask_ref  : (Bt, L, 1)      float 0/1
    # sparse_ref : (L, L)          already causally masked
    # out_ref    : (Bt, L, D_out)
    Bt, L, D_in = x_ref.shape
    D_out = wt_ref.shape[1]

    x = x_ref[...].reshape(Bt * L, D_in)
    wt = wt_ref[...]
    sparse = sparse_ref[...]
    if matmul_dtype is not None:
        x = x.astype(matmul_dtype)
        wt = wt.astype(matmul_dtype)
        sparse = sparse.astype(matmul_dtype)

    # Linear projection for all Bt*L tokens in one MXU matmul (f32 accumulate).
    proj = jnp.dot(x, wt, preferred_element_type=jnp.float32)
    proj = proj + b_ref[...].astype(jnp.float32)

    # Padding mask: one vmul with a lane-broadcast (mask is exactly 0/1).
    proj = proj.reshape(Bt, L, D_out) * pmask_ref[...].astype(jnp.float32)
    if matmul_dtype is not None:
        proj = proj.astype(matmul_dtype)

    # Sparse mixing per batch element (static unroll; Bt is small).
    for b in range(Bt):
        out_ref[b] = jnp.dot(
            sparse, proj[b], preferred_element_type=jnp.float32
        ).astype(out_ref.dtype)


def _pick_batch_tile(B, cap=8):
    bt = min(B, cap)
    while B % bt != 0:
        bt -= 1
    return bt


def togepi_sparse_forward(pre_proj_emb, sparse_mat, proj_weight, proj_bias,
                          padding_mask=None, *, causal=True,
                          matmul_dtype=None, batch_tile=None):
    """Forward pass of TogepiSparse.

    pre_proj_emb : (B, L, D)
    sparse_mat   : (L, L)  learned sparse matrix (already sliced to seq length)
    proj_weight  : (D, D)  PyTorch Linear layout (out_features, in_features)
    proj_bias    : (D,)
    padding_mask : (B, L) float (1 = keep, 0 = pad) or None
    Returns (out (B, L, D), sparse_masked (L, L)).
    """
    B, L, D = pre_proj_emb.shape
    assert sparse_mat.shape == (L, L)

    # --- batch-invariant preprocessing, done exactly once ---
    sparse_masked = _causal_mask_sparse(sparse_mat) if causal else sparse_mat
    w_t = proj_weight.T                               # (D_in, D_out) for x @ W^T
    bias = proj_bias.reshape(1, D)
    if padding_mask is None:
        padding_mask = jnp.ones((B, L), dtype=pre_proj_emb.dtype)
    pmask = padding_mask.reshape(B, L, 1).astype(pre_proj_emb.dtype)

    Bt = _pick_batch_tile(B) if batch_tile is None else batch_tile
    assert B % Bt == 0

    # Rough VMEM budget: double-buffered per-step blocks + resident invariants.
    itemsize = jnp.dtype(pre_proj_emb.dtype).itemsize
    est = 2 * 2 * (Bt * L * D) * itemsize             # x + out, double-buffered
    est += 2 * (D * D + D + Bt * L + L * L) * itemsize
    vmem_limit = int(min(max(2 * est, 32 * 1024 * 1024), 100 * 1024 * 1024))

    grid_spec = pltpu.PrefetchScalarGridSpec(
        num_scalar_prefetch=0,
        grid=(B // Bt,),
        in_specs=[
            pl.BlockSpec((Bt, L, D), lambda b: (b, 0, 0)),   # x
            pl.BlockSpec((D, D), lambda b: (0, 0)),          # W^T  (invariant)
            pl.BlockSpec((1, D), lambda b: (0, 0)),          # bias (invariant)
            pl.BlockSpec((Bt, L, 1), lambda b: (b, 0, 0)),   # padding mask
            pl.BlockSpec((L, L), lambda b: (0, 0)),          # masked sparse (invariant)
        ],
        out_specs=pl.BlockSpec((Bt, L, D), lambda b: (b, 0, 0)),
    )

    out = pl.pallas_call(
        functools.partial(_togepi_sparse_kernel, matmul_dtype=matmul_dtype),
        out_shape=jax.ShapeDtypeStruct((B, L, D), pre_proj_emb.dtype),
        grid_spec=grid_spec,
        compiler_params=pltpu.CompilerParams(
            dimension_semantics=("parallel",),      # distinct out block per step
            vmem_limit_bytes=vmem_limit,
        ),
    )(pre_proj_emb, w_t, bias, pmask, sparse_masked)
    return out, sparse_masked


# ---------------------------------------------------------------------------
# Reference + demo
# ---------------------------------------------------------------------------
def _xavier_normal(key, shape):
    fan_out, fan_in = shape[0], shape[1]
    std = (2.0 / (fan_in + fan_out)) ** 0.5
    return std * jax.random.normal(key, shape, dtype=jnp.float32)


def _reference(pre_proj_emb, sparse_mat, proj_weight, proj_bias, padding_mask):
    L = pre_proj_emb.shape[1]
    causal = jnp.tril(jnp.ones((L, L), dtype=sparse_mat.dtype))
    sparse_masked = jnp.where(causal == 0, 0.0, sparse_mat)
    proj = pre_proj_emb @ proj_weight.T + proj_bias
    if padding_mask is not None:
        proj = jnp.where(padding_mask[:, :, None] == 0, 0.0, proj)
    out = jnp.einsum("kl,bld->bkd", sparse_masked, proj)
    return out, sparse_masked


if __name__ == "__main__":
    # Small shapes consistent with the module: embedding_dim=32, seq len=16, batch=2
    B, L, D = 2, 16, 32
    key = jax.random.PRNGKey(0)
    k_x, k_sp, k_w, k_b = jax.random.split(key, 4)

    pre_proj_emb = jax.random.normal(k_x, (B, L, D), dtype=jnp.float32)
    sparse_mat = _xavier_normal(k_sp, (L, L))              # nn.init.xavier_normal_
    proj_weight = _xavier_normal(k_w, (D, D))              # Linear weight (out, in)
    proj_bias = 0.01 * jax.random.normal(k_b, (D,), dtype=jnp.float32)

    # padding mask: second batch element has its last 4 tokens padded
    padding_mask = jnp.ones((B, L), dtype=jnp.float32)
    padding_mask = padding_mask.at[1, L - 4:].set(0.0)

    out, sparse_masked = togepi_sparse_forward(
        pre_proj_emb, sparse_mat, proj_weight, proj_bias, padding_mask)
    jax.block_until_ready((out, sparse_masked))

    ref_out, ref_sparse = _reference(
        pre_proj_emb, sparse_mat, proj_weight, proj_bias, padding_mask)
    assert jnp.allclose(out, ref_out, atol=1e-4, rtol=1e-4)
    assert jnp.allclose(sparse_masked, ref_sparse, atol=1e-6, rtol=1e-6)

    print("KERNEL_OK")
</pallas_src>

<mosaic_0001>
module attributes {stable_mosaic.version = 11 : i64} {
  func.func @_causal_mask_kernel(%arg0: memref<16x16xf32, #tpu.memory_space<vmem>>, %arg1: memref<16x16xf32, #tpu.memory_space<vmem>>) attributes {dimension_semantics = [], scalar_prefetch = 0 : i64, scratch_operands = 0 : i64, tpu.core_type = #tpu.core_type<tc>} {
    %0 = tpu.iota {dimensions = array<i32: 0>} : vector<16x16xi32>
    %1 = tpu.iota {dimensions = array<i32: 1>} : vector<16x16xi32>
    %c0 = arith.constant 0 : index
    %c0_0 = arith.constant 0 : index
    %2 = vector.load %arg0[%c0, %c0_0] : memref<16x16xf32, #tpu.memory_space<vmem>>, vector<16x16xf32>
    %3 = arith.cmpi sle, %1, %0 : vector<16x16xi32>
    %cst = arith.constant 0.000000e+00 : f32
    %4 = vector.broadcast %cst : f32 to vector<16x16xf32>
    %5 = arith.select %3, %2, %4 : vector<16x16xi1>, vector<16x16xf32>
    %c0_1 = arith.constant 0 : index
    %c0_2 = arith.constant 0 : index
    %6 = vector.load %arg1[%c0_1, %c0_2] : memref<16x16xf32, #tpu.memory_space<vmem>>, vector<16x16xf32>
    tpu.vector_store %arg1[%c0_1, %c0_2], %5 {strides = array<i32>} : memref<16x16xf32, #tpu.memory_space<vmem>>, vector<16x16xf32>,
    return
  }
}

</mosaic_0001>

<bundles_post_ra>
// kernel: tpu_custom_call.1
= control target key start
LH: loop header
LB: loop body
LE: loop exit
PB: predicated region body
PF: predicated region fallthrough
CT: control target
= control target key end

     0   :  { %6 = vsyncpa [#allocation3], 0  ;;  %s134_s0 = inlined_call_operand.hbm [shape: f32[16,16], index: 0, kind: input, shape index: {}]   ;;  %s135_s1 = inlined_call_operand.hbm [shape: f32[16,16], index: 1, kind: output, shape index: {}]  }
   0x1   :  { %7 = vsyncpa [#allocation4], 0  ;;  %s12_s8 = sshll.u32 %s134_s0, 4  ;;  %s114_s9 = smov [#allocation2]   ;;  %s13_s8 = int_to_ptr.hbm [resolvable:$true] %s12_s8 }
   0x2   :  { %s14_s10 = sshll.u32 %s114_s9, 4  ;;  %s115_s11 = smov 128   ;;  %s15_s10 = int_to_ptr.vmem [resolvable:$true] %s14_s10 }
   0x3   :  { %s116_s12 = smov 8  }
   0x4   :  { %20 = dma.hbm_to_vmem [thread:$0]  %s13_s8, 256, %s15_s10, [#allocation3], %s115_s11, %s115_s11, %s116_s12  }
   0x5   :  { %110 = dma.done.wait [#allocation3], 256  }
   0x6   :  { %111 = vsyncadd [#allocation3], 4294967040  ;;  %v25_v0 = vlaneseq  ;;  %s117_s13 = smov [#allocation5]   ;;  %s45_s0 = sshll.u32 %s135_s1, 4  ;;  %vm36_vm1 = vcmask 130048   ;;  %v30_v4 = vld [vmem:[#allocation2] sm:$0xff]  ;;  %s46_s0 = int_to_ptr.hbm [resolvable:$true] %s45_s0 }
   0x7   :  { %s43_s14 = sshll.u32 %s117_s13, 4  ;;  %v31_v5 = vld [vmem:[#allocation2 + $0x8] sm:$0xff]  ;;  %s44_s14 = int_to_ptr.vmem [resolvable:$true] %s43_s14 }
   0x8   :  { %v26_v1 = vshrl.u32 %v25_v0, 7  ;;  %v29_v2 = vand.u32 127, %v25_v0 }
   0xa   :  { %v27_v3 = vadd.s32 8, %v26_v1  ;;  %vm32_vm0 = vcmp.le.s32.totalorder %v29_v2, %v26_v1 }
   0xb   :  { %v34_v6 = vsel %vm32_vm0, %v30_v4, 0.0 }
   0xc   :  { %vm33_vm2 = vcmp.le.s32.totalorder %v29_v2, %v27_v3  ;;  %37 = vst.msk [vmem:[#allocation5] sm:$0xff] %vm36_vm1, %v34_v6 }
   0xd   :  { %v35_v7 = vsel %vm33_vm2, %v31_v5, 0.0 }
   0xe   :  { %38 = vst.msk [vmem:[#allocation5 + $0x8] sm:$0xff] %vm36_vm1, %v35_v7 }
   0xf   :  { %51 = dma.vmem_to_hbm [thread:$0]  %s44_s14, 256, %s46_s0, [#allocation4], %s115_s11, %s115_s11, %s116_s12  }
  0x10   :  { %112 = dma.done.wait [#allocation4], 256  }
  0x11   :  { %113 = vsyncadd [#allocation4], 4294967040 }
  0x12   :  { %56 = vsyncpa [#allocation3], 1 }
  0x13   :  { %57 = vsyncpa [#allocation4], 1 }

</bundles_post_ra>
